<compile_context>
chip_gen: v7x
topology: tpu7x:2x2x1
jax: 0.10.0
libtpu: 0.0.40
codegen_flags: <defaults>
</compile_context>

<pallas_src>
import jax
import jax.numpy as jnp
from jax.experimental import pallas as pl
from jax.experimental.pallas import tpu as pltpu


def task_selection_kernel(inv_temp_ref, b2_ref, robot_ref, task_ref,
                          w1r_ref, w1t_ref, b1_ref, w2c_ref, out_ref):
    # inv_temp_ref, b2_ref : (1, 1) SMEM scalars (runtime temperature / bias)
    # robot_ref: (TN, H), task_ref: (M, D)
    # w1r_ref: (H, K), w1t_ref: (D, K), b1_ref: (1, K), w2c_ref: (K, 1)
    # out_ref : (TN, M)
    inv_temp = inv_temp_ref[0, 0]
    b2 = b2_ref[0, 0]

    # First Linear, split over the concat axis (both matmuls on the MXU).
    rproj = jnp.dot(robot_ref[...], w1r_ref[...],
                    preferred_element_type=jnp.float32) + b1_ref[...]     # (TN, K)
    tproj = jnp.dot(task_ref[...], w1t_ref[...],
                    preferred_element_type=jnp.float32)                   # (M, K)

    M = tproj.shape[0]
    w2c = w2c_ref[...]                                                    # (K, 1)

    # Second Linear: K-reduction on the MXU via M narrow matvecs (unrolled over
    # the small, static task count).  No (TN, M, K) intermediate is built.
    cols = []
    for j in range(M):
        h_j = rproj + tproj[j:j + 1, :]           # (TN, K) sublane-broadcast add
        h_j = jnp.maximum(h_j, 0.1 * h_j)         # LeakyReLU(0.1) as a single vmax
        cols.append(jnp.dot(h_j, w2c,
                            preferred_element_type=jnp.float32))          # (TN, 1)
    scores = jnp.concatenate(cols, axis=1) + b2                           # (TN, M)

    # clamp, subtract row max, softmax(scores / temperature), clamp probs
    scores = jnp.clip(scores, -10.0, 10.0)
    scores = scores - jnp.max(scores, axis=1, keepdims=True)
    e = jnp.exp(scores * inv_temp)
    probs = e * pl.reciprocal(jnp.sum(e, axis=1, keepdims=True), approx=False)
    out_ref[...] = jnp.clip(probs, 1e-6, 1.0 - 1e-6).astype(out_ref.dtype)


def prepare_params(w1, b1, w2, b2, robot_hidden_dim):
    """Hoistable per-model prep: split concat-weight, reshape biases / w2."""
    H = robot_hidden_dim
    K = w1.shape[1]
    w1r = w1[:H, :].astype(jnp.float32)            # (H, K)
    w1t = w1[H:, :].astype(jnp.float32)            # (D, K)
    b1_k = b1.reshape(1, K).astype(jnp.float32)    # (1, K)  VMEM row
    w2c = w2.reshape(K, 1).astype(jnp.float32)     # (K, 1)  MXU matvec RHS
    b2_s = b2.reshape(1, 1).astype(jnp.float32)    # (1, 1)  SMEM scalar
    return w1r, w1t, b1_k, w2c, b2_s


def _vmem_capacity_bytes():
    try:
        return int(pltpu.get_tpu_info().vmem_capacity_bytes)
    except Exception:
        return 64 << 20   # conservative fallback (v7x per-TensorCore)


def _choose_tile_n(N, H, M, K, vmem_cap):
    """Pick the robot-row tile.  Footprint per row is only the double-buffered
    robot/out blocks plus ~3 live (TN, K) temporaries (no 3-D tensor anymore)."""
    bytes_per_row = 4 * (2 * H + 2 * M + 3 * K)
    budget = max(4 << 20, min(24 << 20, vmem_cap // 4))
    tn = budget // max(bytes_per_row, 1)
    tn = max(8, min(1024, (tn // 8) * 8))
    if N <= 8:
        return N                      # single tiny block (full-dim block is legal)
    if N <= tn:
        # Guarantee >= 2 grid steps so the "parallel" axis can shard across the
        # two TensorCores on v7x (one extra ~0.35us step elsewhere: negligible).
        half = -(-N // 2)
        half = -(-half // 8) * 8
        return min(tn, half)
    return tn


def task_selection_forward(robot_features, task_features, params, inv_temp):
    """Run the Pallas kernel.  `inv_temp` is a runtime (1, 1) f32 array, so varying
    the temperature across episodes does NOT trigger recompilation."""
    w1r, w1t, b1_k, w2c, b2_s = params
    N, H = robot_features.shape
    M, D = task_features.shape
    K = w1r.shape[1]

    cap = _vmem_capacity_bytes()
    TN = _choose_tile_n(N, H, M, K, cap)
    grid = (pl.cdiv(N, TN),)

    # Explicit scoped-VMEM limit (v5e default is only 16 MiB); bounded well under
    # physical capacity on every generation.
    est_bytes = 4 * (TN * (2 * H + 2 * M + 3 * K) + M * D + (H + D + 2) * K)
    vmem_limit = int(min(cap * 3 // 4, max(32 << 20, est_bytes + (8 << 20))))

    smem = pltpu.MemorySpace.SMEM
    out = pl.pallas_call(
        task_selection_kernel,
        out_shape=jax.ShapeDtypeStruct((N, M), jnp.float32),
        grid=grid,
        in_specs=[
            pl.BlockSpec((1, 1), lambda i: (0, 0), memory_space=smem),  # inv_temp
            pl.BlockSpec((1, 1), lambda i: (0, 0), memory_space=smem),  # b2
            pl.BlockSpec((TN, H), lambda i: (i, 0)),                    # robot tile
            pl.BlockSpec((M, D), lambda i: (0, 0)),                     # tasks (resident)
            pl.BlockSpec((H, K), lambda i: (0, 0)),                     # w1[:H]
            pl.BlockSpec((D, K), lambda i: (0, 0)),                     # w1[H:]
            pl.BlockSpec((1, K), lambda i: (0, 0)),                     # b1
            pl.BlockSpec((K, 1), lambda i: (0, 0)),                     # w2 column
        ],
        out_specs=pl.BlockSpec((TN, M), lambda i: (i, 0)),
        compiler_params=pltpu.CompilerParams(
            dimension_semantics=("parallel",),
            vmem_limit_bytes=vmem_limit),
    )(inv_temp, b2_s, robot_features, task_features, w1r, w1t, b1_k, w2c)
    return out


def task_selection_mlp(robot_features, task_features, w1, b1, w2, b2,
                       temperature=1.0, num_episodes=1000, c_episode=None):
    """Convenience wrapper mirroring TaskSelectionMLP.forward.  For an episode
    loop, call prepare_params() once and task_selection_forward() per step."""
    N, H = robot_features.shape
    params = prepare_params(w1, b1, w2, b2, H)
    if c_episode is not None:
        current_temp = jnp.maximum(
            jnp.float32(temperature) * (1.0 - jnp.float32(c_episode) / num_episodes),
            jnp.float32(0.1))
    else:
        current_temp = jnp.float32(temperature)
    inv_temp = (1.0 / current_temp).astype(jnp.float32).reshape(1, 1)
    return task_selection_forward(robot_features.astype(jnp.float32),
                                  task_features.astype(jnp.float32),
                                  params, inv_temp)


def reference(robot_features, task_features, w1, b1, w2, b2, temperature=1.0):
    N, H = robot_features.shape
    M, D = task_features.shape
    robot_e = jnp.broadcast_to(robot_features[:, None, :], (N, M, H))
    task_e = jnp.broadcast_to(task_features[None, :, :], (N, M, D))
    combined = jnp.concatenate([robot_e, task_e], axis=2).reshape(-1, H + D)
    h = combined @ w1 + b1
    h = jnp.where(h > 0, h, 0.1 * h)
    scores = (h @ w2 + b2).reshape(N, M)
    scores = jnp.clip(scores, -10.0, 10.0)
    scores = scores - jnp.max(scores, axis=1, keepdims=True)
    probs = jax.nn.softmax(scores / temperature, axis=1)
    return jnp.clip(probs, 1e-6, 1.0 - 1e-6)


if __name__ == "__main__":
    # Small shapes consistent with the module's forward.
    N = 8              # number of robots
    M = 8              # number of tasks
    H = 32             # robot_hidden_dim
    D = 16             # task_dim
    MLP_HIDDEN = 128

    key = jax.random.PRNGKey(0)
    k_r, k_t, k_w1, k_b1, k_w2, k_b2 = jax.random.split(key, 6)

    robot_features = jax.random.normal(k_r, (N, H), dtype=jnp.float32)
    task_features = jax.random.normal(k_t, (M, D), dtype=jnp.float32)

    # Deterministic parameter init (PyTorch-Linear-style uniform bounds).
    bound1 = 1.0 / jnp.sqrt(H + D)
    w1 = jax.random.uniform(k_w1, (H + D, MLP_HIDDEN), jnp.float32, -bound1, bound1)
    b1 = jax.random.uniform(k_b1, (MLP_HIDDEN,), jnp.float32, -bound1, bound1)
    bound2 = 1.0 / jnp.sqrt(MLP_HIDDEN)
    w2 = jax.random.uniform(k_w2, (MLP_HIDDEN, 1), jnp.float32, -bound2, bound2)
    b2 = jax.random.uniform(k_b2, (1,), jnp.float32, -bound2, bound2)

    # Tolerance note: the kernel's MXU f32 matmuls (multi-pass bf16 decomposition)
    # and the XLA-dot reference can differ at the ~1e-3 level in raw scores; the
    # resulting probabilities agree well within 2e-3.
    ATOL, RTOL = 2e-3, 2e-3

    # Default temperature.
    out = task_selection_mlp(robot_features, task_features, w1, b1, w2, b2,
                             temperature=1.0)
    out = jax.block_until_ready(out)
    ref = reference(robot_features, task_features, w1, b1, w2, b2, temperature=1.0)
    assert out.shape == (N, M)
    assert bool(jnp.all(jnp.isfinite(out)))
    assert jnp.allclose(out, ref, atol=ATOL, rtol=RTOL), (out, ref)
    assert jnp.allclose(jnp.sum(out, axis=1), 1.0, atol=1e-4)

    # Annealed temperature via c_episode (runtime SMEM scalar -> same compiled kernel).
    out2 = task_selection_mlp(robot_features, task_features, w1, b1, w2, b2,
                              temperature=1.0, num_episodes=1000, c_episode=250)
    out2 = jax.block_until_ready(out2)
    ref2 = reference(robot_features, task_features, w1, b1, w2, b2, temperature=0.75)
    assert jnp.allclose(out2, ref2, atol=ATOL, rtol=RTOL), (out2, ref2)

    print("KERNEL_OK")
</pallas_src>

<mosaic_0001>
module attributes {stable_mosaic.version = 11 : i64} {
  func.func @task_selection_kernel(%arg0: i32, %arg1: memref<1x1xf32, #tpu.memory_space<smem>>, %arg2: memref<1x1xf32, #tpu.memory_space<smem>>, %arg3: memref<8x32xf32, #tpu.memory_space<vmem>>, %arg4: memref<8x16xf32, #tpu.memory_space<vmem>>, %arg5: memref<32x128xf32, #tpu.memory_space<vmem>>, %arg6: memref<16x128xf32, #tpu.memory_space<vmem>>, %arg7: memref<1x128xf32, #tpu.memory_space<vmem>>, %arg8: memref<128x1xf32, #tpu.memory_space<vmem>>, %arg9: memref<8x8xf32, #tpu.memory_space<vmem>>) attributes {dimension_semantics = [#tpu.dimension_semantics<parallel>], iteration_bounds = array<i64: 1>, scalar_prefetch = 0 : i64, scratch_operands = 0 : i64, tpu.core_type = #tpu.core_type<tc>, window_params = [{transform_indices = @transform_0, window_bounds = array<i64: 1, 1>}, {transform_indices = @transform_1, window_bounds = array<i64: 1, 1>}, {transform_indices = @transform_2, window_bounds = array<i64: 8, 32>}, {pipeline_mode = #tpu.pipeline_mode<synchronous>, transform_indices = @transform_3, window_bounds = array<i64: 8, 16>}, {pipeline_mode = #tpu.pipeline_mode<synchronous>, transform_indices = @transform_4, window_bounds = array<i64: 32, 128>}, {pipeline_mode = #tpu.pipeline_mode<synchronous>, transform_indices = @transform_5, window_bounds = array<i64: 16, 128>}, {pipeline_mode = #tpu.pipeline_mode<synchronous>, transform_indices = @transform_6, window_bounds = array<i64: 1, 128>}, {pipeline_mode = #tpu.pipeline_mode<synchronous>, transform_indices = @transform_7, window_bounds = array<i64: 128, 1>}, {transform_indices = @transform_8, window_bounds = array<i64: 8, 8>}]} {
    %c0 = arith.constant 0 : index
    %c0_0 = arith.constant 0 : index
    %0 = memref.load %arg1[%c0, %c0_0] : memref<1x1xf32, #tpu.memory_space<smem>>
    %c0_1 = arith.constant 0 : index
    %c0_2 = arith.constant 0 : index
    %1 = memref.load %arg2[%c0_1, %c0_2] : memref<1x1xf32, #tpu.memory_space<smem>>
    %c0_3 = arith.constant 0 : index
    %c0_4 = arith.constant 0 : index
    %2 = vector.load %arg3[%c0_3, %c0_4] : memref<8x32xf32, #tpu.memory_space<vmem>>, vector<8x32xf32>
    %c0_5 = arith.constant 0 : index
    %c0_6 = arith.constant 0 : index
    %3 = vector.load %arg5[%c0_5, %c0_6] : memref<32x128xf32, #tpu.memory_space<vmem>>, vector<32x128xf32>
    %cst = arith.constant dense<0.000000e+00> : vector<8x128xf32>
    %4 = tpu.matmul %2, %3, %cst {dimension_numbers = #tpu.dot_dimension_numbers<[1], [0], [0], [1], [0, 0, 1, 1], [], []>} : vector<8x32xf32>, vector<32x128xf32>, vector<8x128xf32> -> vector<8x128xf32>
    %c0_7 = arith.constant 0 : index
    %c0_8 = arith.constant 0 : index
    %5 = vector.load %arg7[%c0_7, %c0_8] : memref<1x128xf32, #tpu.memory_space<vmem>>, vector<1x128xf32>
    %6 = vector.broadcast %5 : vector<1x128xf32> to vector<8x128xf32>
    %7 = arith.addf %4, %6 : vector<8x128xf32>
    %c0_9 = arith.constant 0 : index
    %c0_10 = arith.constant 0 : index
    %8 = vector.load %arg4[%c0_9, %c0_10] : memref<8x16xf32, #tpu.memory_space<vmem>>, vector<8x16xf32>
    %c0_11 = arith.constant 0 : index
    %c0_12 = arith.constant 0 : index
    %9 = vector.load %arg6[%c0_11, %c0_12] : memref<16x128xf32, #tpu.memory_space<vmem>>, vector<16x128xf32>
    %cst_13 = arith.constant dense<0.000000e+00> : vector<8x128xf32>
    %10 = tpu.matmul %8, %9, %cst_13 {dimension_numbers = #tpu.dot_dimension_numbers<[1], [0], [0], [1], [0, 0, 1, 1], [], []>} : vector<8x16xf32>, vector<16x128xf32>, vector<8x128xf32> -> vector<8x128xf32>
    %c0_14 = arith.constant 0 : index
    %c0_15 = arith.constant 0 : index
    %11 = vector.load %arg8[%c0_14, %c0_15] : memref<128x1xf32, #tpu.memory_space<vmem>>, vector<128x1xf32>
    %12 = vector.extract_strided_slice %10 {offsets = [0, 0], sizes = [1, 128], strides = [1, 1]} : vector<8x128xf32> to vector<1x128xf32>
    %13 = vector.broadcast %12 : vector<1x128xf32> to vector<8x128xf32>
    %14 = arith.addf %7, %13 : vector<8x128xf32>
    %cst_16 = arith.constant 1.000000e-01 : f32
    %15 = vector.broadcast %cst_16 : f32 to vector<8x128xf32>
    %16 = arith.mulf %15, %14 : vector<8x128xf32>
    %17 = arith.maximumf %14, %16 : vector<8x128xf32>
    %cst_17 = arith.constant dense<0.000000e+00> : vector<8x1xf32>
    %18 = tpu.matmul %17, %11, %cst_17 {dimension_numbers = #tpu.dot_dimension_numbers<[1], [0], [0], [1], [0, 0, 1, 1], [], []>} : vector<8x128xf32>, vector<128x1xf32>, vector<8x1xf32> -> vector<8x1xf32>
    %19 = vector.extract_strided_slice %10 {offsets = [1, 0], sizes = [1, 128], strides = [1, 1]} : vector<8x128xf32> to vector<1x128xf32>
    %20 = vector.broadcast %19 : vector<1x128xf32> to vector<8x128xf32>
    %21 = arith.addf %7, %20 : vector<8x128xf32>
    %cst_18 = arith.constant 1.000000e-01 : f32
    %22 = vector.broadcast %cst_18 : f32 to vector<8x128xf32>
    %23 = arith.mulf %22, %21 : vector<8x128xf32>
    %24 = arith.maximumf %21, %23 : vector<8x128xf32>
    %cst_19 = arith.constant dense<0.000000e+00> : vector<8x1xf32>
    %25 = tpu.matmul %24, %11, %cst_19 {dimension_numbers = #tpu.dot_dimension_numbers<[1], [0], [0], [1], [0, 0, 1, 1], [], []>} : vector<8x128xf32>, vector<128x1xf32>, vector<8x1xf32> -> vector<8x1xf32>
    %26 = vector.extract_strided_slice %10 {offsets = [2, 0], sizes = [1, 128], strides = [1, 1]} : vector<8x128xf32> to vector<1x128xf32>
    %27 = vector.broadcast %26 : vector<1x128xf32> to vector<8x128xf32>
    %28 = arith.addf %7, %27 : vector<8x128xf32>
    %cst_20 = arith.constant 1.000000e-01 : f32
    %29 = vector.broadcast %cst_20 : f32 to vector<8x128xf32>
    %30 = arith.mulf %29, %28 : vector<8x128xf32>
    %31 = arith.maximumf %28, %30 : vector<8x128xf32>
    %cst_21 = arith.constant dense<0.000000e+00> : vector<8x1xf32>
    %32 = tpu.matmul %31, %11, %cst_21 {dimension_numbers = #tpu.dot_dimension_numbers<[1], [0], [0], [1], [0, 0, 1, 1], [], []>} : vector<8x128xf32>, vector<128x1xf32>, vector<8x1xf32> -> vector<8x1xf32>
    %33 = vector.extract_strided_slice %10 {offsets = [3, 0], sizes = [1, 128], strides = [1, 1]} : vector<8x128xf32> to vector<1x128xf32>
    %34 = vector.broadcast %33 : vector<1x128xf32> to vector<8x128xf32>
    %35 = arith.addf %7, %34 : vector<8x128xf32>
    %cst_22 = arith.constant 1.000000e-01 : f32
    %36 = vector.broadcast %cst_22 : f32 to vector<8x128xf32>
    %37 = arith.mulf %36, %35 : vector<8x128xf32>
    %38 = arith.maximumf %35, %37 : vector<8x128xf32>
    %cst_23 = arith.constant dense<0.000000e+00> : vector<8x1xf32>
    %39 = tpu.matmul %38, %11, %cst_23 {dimension_numbers = #tpu.dot_dimension_numbers<[1], [0], [0], [1], [0, 0, 1, 1], [], []>} : vector<8x128xf32>, vector<128x1xf32>, vector<8x1xf32> -> vector<8x1xf32>
    %40 = vector.extract_strided_slice %10 {offsets = [4, 0], sizes = [1, 128], strides = [1, 1]} : vector<8x128xf32> to vector<1x128xf32>
    %41 = vector.broadcast %40 : vector<1x128xf32> to vector<8x128xf32>
    %42 = arith.addf %7, %41 : vector<8x128xf32>
    %cst_24 = arith.constant 1.000000e-01 : f32
    %43 = vector.broadcast %cst_24 : f32 to vector<8x128xf32>
    %44 = arith.mulf %43, %42 : vector<8x128xf32>
    %45 = arith.maximumf %42, %44 : vector<8x128xf32>
    %cst_25 = arith.constant dense<0.000000e+00> : vector<8x1xf32>
    %46 = tpu.matmul %45, %11, %cst_25 {dimension_numbers = #tpu.dot_dimension_numbers<[1], [0], [0], [1], [0, 0, 1, 1], [], []>} : vector<8x128xf32>, vector<128x1xf32>, vector<8x1xf32> -> vector<8x1xf32>
    %47 = vector.extract_strided_slice %10 {offsets = [5, 0], sizes = [1, 128], strides = [1, 1]} : vector<8x128xf32> to vector<1x128xf32>
    %48 = vector.broadcast %47 : vector<1x128xf32> to vector<8x128xf32>
    %49 = arith.addf %7, %48 : vector<8x128xf32>
    %cst_26 = arith.constant 1.000000e-01 : f32
    %50 = vector.broadcast %cst_26 : f32 to vector<8x128xf32>
    %51 = arith.mulf %50, %49 : vector<8x128xf32>
    %52 = arith.maximumf %49, %51 : vector<8x128xf32>
    %cst_27 = arith.constant dense<0.000000e+00> : vector<8x1xf32>
    %53 = tpu.matmul %52, %11, %cst_27 {dimension_numbers = #tpu.dot_dimension_numbers<[1], [0], [0], [1], [0, 0, 1, 1], [], []>} : vector<8x128xf32>, vector<128x1xf32>, vector<8x1xf32> -> vector<8x1xf32>
    %54 = vector.extract_strided_slice %10 {offsets = [6, 0], sizes = [1, 128], strides = [1, 1]} : vector<8x128xf32> to vector<1x128xf32>
    %55 = vector.broadcast %54 : vector<1x128xf32> to vector<8x128xf32>
    %56 = arith.addf %7, %55 : vector<8x128xf32>
    %cst_28 = arith.constant 1.000000e-01 : f32
    %57 = vector.broadcast %cst_28 : f32 to vector<8x128xf32>
    %58 = arith.mulf %57, %56 : vector<8x128xf32>
    %59 = arith.maximumf %56, %58 : vector<8x128xf32>
    %cst_29 = arith.constant dense<0.000000e+00> : vector<8x1xf32>
    %60 = tpu.matmul %59, %11, %cst_29 {dimension_numbers = #tpu.dot_dimension_numbers<[1], [0], [0], [1], [0, 0, 1, 1], [], []>} : vector<8x128xf32>, vector<128x1xf32>, vector<8x1xf32> -> vector<8x1xf32>
    %61 = vector.extract_strided_slice %10 {offsets = [7, 0], sizes = [1, 128], strides = [1, 1]} : vector<8x128xf32> to vector<1x128xf32>
    %62 = vector.broadcast %61 : vector<1x128xf32> to vector<8x128xf32>
    %63 = arith.addf %7, %62 : vector<8x128xf32>
    %cst_30 = arith.constant 1.000000e-01 : f32
    %64 = vector.broadcast %cst_30 : f32 to vector<8x128xf32>
    %65 = arith.mulf %64, %63 : vector<8x128xf32>
    %66 = arith.maximumf %63, %65 : vector<8x128xf32>
    %cst_31 = arith.constant dense<0.000000e+00> : vector<8x1xf32>
    %67 = tpu.matmul %66, %11, %cst_31 {dimension_numbers = #tpu.dot_dimension_numbers<[1], [0], [0], [1], [0, 0, 1, 1], [], []>} : vector<8x128xf32>, vector<128x1xf32>, vector<8x1xf32> -> vector<8x1xf32>
    %68 = tpu.concatenate %18, %25, %32, %39, %46, %53, %60, %67 in 1 : vector<8x1xf32>, vector<8x1xf32>, vector<8x1xf32>, vector<8x1xf32>, vector<8x1xf32>, vector<8x1xf32>, vector<8x1xf32>, vector<8x1xf32> -> vector<8x8xf32>
    %69 = vector.broadcast %1 : f32 to vector<8x8xf32>
    %70 = arith.addf %68, %69 : vector<8x8xf32>
    %cst_32 = arith.constant -1.000000e+01 : f32
    %cst_33 = arith.constant 1.000000e+01 : f32
    %71 = vector.broadcast %cst_32 : f32 to vector<8x8xf32>
    %72 = arith.maximumf %71, %70 : vector<8x8xf32>
    %73 = vector.broadcast %cst_33 : f32 to vector<8x8xf32>
    %74 = arith.minimumf %73, %72 : vector<8x8xf32>
    %cst_34 = arith.constant dense<0xFF800000> : vector<8xf32>
    %75 = vector.multi_reduction <maximumf>, %74, %cst_34 [1] : vector<8x8xf32> to vector<8xf32>
    %76 = vector.shape_cast %75 : vector<8xf32> to vector<8x1xf32>
    %77 = vector.broadcast %76 : vector<8x1xf32> to vector<8x8xf32>
    %78 = arith.subf %74, %77 : vector<8x8xf32>
    %79 = vector.broadcast %0 : f32 to vector<8x8xf32>
    %80 = arith.mulf %78, %79 : vector<8x8xf32>
    %81 = math.exp %80 : vector<8x8xf32>
    %cst_35 = arith.constant dense<0.000000e+00> : vector<8xf32>
    %82 = vector.multi_reduction <add>, %81, %cst_35 [1] : vector<8x8xf32> to vector<8xf32>
    %83 = vector.shape_cast %82 : vector<8xf32> to vector<8x1xf32>
    %84 = tpu.reciprocal %83 : vector<8x1xf32> -> vector<8x1xf32>
    %85 = vector.broadcast %84 : vector<8x1xf32> to vector<8x8xf32>
    %86 = arith.mulf %81, %85 : vector<8x8xf32>
    %cst_36 = arith.constant 9.99999997E-7 : f32
    %cst_37 = arith.constant 0.999998986 : f32
    %87 = vector.broadcast %cst_36 : f32 to vector<8x8xf32>
    %88 = arith.maximumf %87, %86 : vector<8x8xf32>
    %89 = vector.broadcast %cst_37 : f32 to vector<8x8xf32>
    %90 = arith.minimumf %89, %88 : vector<8x8xf32>
    %c0_38 = arith.constant 0 : index
    %c0_39 = arith.constant 0 : index
    %91 = vector.load %arg9[%c0_38, %c0_39] : memref<8x8xf32, #tpu.memory_space<vmem>>, vector<8x8xf32>
    tpu.vector_store %arg9[%c0_38, %c0_39], %90 {strides = array<i32>} : memref<8x8xf32, #tpu.memory_space<vmem>>, vector<8x8xf32>,
    return
  }
  func.func @transform_0(%arg0: i32) -> (i32, i32) {
    %c0_i32 = arith.constant 0 : i32
    %c0_i32_0 = arith.constant 0 : i32
    %c0_i32_1 = arith.constant 0 : i32
    return %c0_i32, %c0_i32_0 : i32, i32
  }
  func.func @transform_1(%arg0: i32) -> (i32, i32) {
    %c0_i32 = arith.constant 0 : i32
    %c0_i32_0 = arith.constant 0 : i32
    %c0_i32_1 = arith.constant 0 : i32
    return %c0_i32, %c0_i32_0 : i32, i32
  }
  func.func @transform_2(%arg0: i32) -> (i32, i32) {
    %c0_i32 = arith.constant 0 : i32
    %c0_i32_0 = arith.constant 0 : i32
    return %arg0, %c0_i32 : i32, i32
  }
  func.func @transform_3(%arg0: i32) -> (i32, i32) {
    %c0_i32 = arith.constant 0 : i32
    %c0_i32_0 = arith.constant 0 : i32
    %c0_i32_1 = arith.constant 0 : i32
    return %c0_i32, %c0_i32_0 : i32, i32
  }
  func.func @transform_4(%arg0: i32) -> (i32, i32) {
    %c0_i32 = arith.constant 0 : i32
    %c0_i32_0 = arith.constant 0 : i32
    %c0_i32_1 = arith.constant 0 : i32
    return %c0_i32, %c0_i32_0 : i32, i32
  }
  func.func @transform_5(%arg0: i32) -> (i32, i32) {
    %c0_i32 = arith.constant 0 : i32
    %c0_i32_0 = arith.constant 0 : i32
    %c0_i32_1 = arith.constant 0 : i32
    return %c0_i32, %c0_i32_0 : i32, i32
  }
  func.func @transform_6(%arg0: i32) -> (i32, i32) {
    %c0_i32 = arith.constant 0 : i32
    %c0_i32_0 = arith.constant 0 : i32
    %c0_i32_1 = arith.constant 0 : i32
    return %c0_i32, %c0_i32_0 : i32, i32
  }
  func.func @transform_7(%arg0: i32) -> (i32, i32) {
    %c0_i32 = arith.constant 0 : i32
    %c0_i32_0 = arith.constant 0 : i32
    %c0_i32_1 = arith.constant 0 : i32
    return %c0_i32, %c0_i32_0 : i32, i32
  }
  func.func @transform_8(%arg0: i32) -> (i32, i32) {
    %c0_i32 = arith.constant 0 : i32
    %c0_i32_0 = arith.constant 0 : i32
    return %arg0, %c0_i32 : i32, i32
  }
}

</mosaic_0001>

<bundles_post_ra>
// kernel: tpu_custom_call.1
= control target key start
LH: loop header
LB: loop body
LE: loop exit
PB: predicated region body
PF: predicated region fallthrough
CT: control target
= control target key end

     0   :  { %v1592_v3 = vmov 0.0|0.0   ;;  %vm1593_vm0 = vmmov 0   ;;  %v1594_v9 = vmov 0.0   ;;  %vm123_vm1 = vcmask 130048   ;;  %s1927_s0 = inlined_call_operand.<no memory space> [shape: f32[1,1], index: 0, kind: input, shape index: {}]   ;;  %s1928_s1 = inlined_call_operand.<no memory space> [shape: f32[1,1], index: 1, kind: input, shape index: {}]   ;;  %s1929_s2 = inlined_call_operand.vmem [shape: f32[8,32], index: 2, kind: input, shape index: {}]   ;;  %s1930_s3 = inlined_call_operand.vmem [shape: f32[8,16], index: 3, kind: input, shape index: {}]   ;;  %s1931_s4 = inlined_call_operand.vmem [shape: f32[32,128], index: 4, kind: input, shape index: {}]   ;;  %s1932_s5 = inlined_call_operand.vmem [shape: f32[16,128], index: 5, kind: input, shape index: {}]   ;;  %s1933_s6 = inlined_call_operand.vmem [shape: f32[1,128], index: 6, kind: input, shape index: {}]   ;;  %s1934_s7 = inlined_call_operand.vmem [shape: f32[128,1], index: 7, kind: input, shape index: {}]   ;;  %s1935_s8 = inlined_call_operand.hbm [shape: f32[8,8], index: 8, kind: output, shape index: {}]  }
   0x1   :  { %v35_v0 = vld [vmem:[%s1931_s4] sm:$0xff]  ;;  %v36_v1 = vld [vmem:[%s1931_s4 + $0x8] sm:$0xff]  ;;  %1352 = vmatprep.subr.bf16.mxu0 %v1592_v3  ;;  %1358 = vmatprep.subr.bf16.mxu1 %v1592_v3  ;;  %v37_v6 = vld [vmem:[%s1931_s4 + $0x10] sm:$0xff] }
   0x2   :  { %v121_v2 = vld [vmem:[%s1932_s5] sm:$0xff]  ;;  %v1353_v4 = vpack.c.bf16 %v36_v1, %v35_v0  ;;  %v122_v5 = vld [vmem:[%s1932_s5 + $0x8] sm:$0xff]  ;;  %v38_v7 = vld [vmem:[%s1931_s4 + $0x18] sm:$0xff]  ;;  %1069 = vmatprep.mubr.msk.f32.mxu1 %vm1593_vm0, %v1594_v9  ;;  %1062 = vmatprep.mubr.msk.f32.mxu0 %vm1593_vm0, %v1594_v9 }
   0x3   :  { %v1359_v8 = vpack.c.bf16 %v122_v5, %v121_v2  ;;  %v197_v10 = vld [vmem:[%s1934_s7] sm:$0xff]  ;;  %v1356_v11 = vpack.c.bf16 %v38_v7, %v37_v6  ;;  %v198_v12 = vld [vmem:[%s1934_s7 + $0x8] sm:$0xff]  ;;  %v199_v15 = vld [vmem:[%s1934_s7 + $0x10] sm:$0xff] }
   0x4   :  { %1354 = vmatpush3.bf16.msra.mxu0 %v1353_v4  ;;  %v120_v13 = vld [vmem:[%s1930_s3] sm:$0xff]  ;;  %v1682_v14 = vpack.c.bf16 %v198_v12, %v197_v10  ;;  %v200_v16 = vld [vmem:[%s1934_s7 + $0x18] sm:$0xff] }
   0x5   :  { %1355 = vmatprep.subr.bf16.mxu0 %v1592_v3  ;;  %1360 = vmatpush3.bf16.msra.mxu1 %v1359_v8 }
   0x6   :  { %1361 = vmatprep.subr.bf16.mxu1 %v1592_v3 }
   0x7   :  { %15 = vsyncpa [#allocation5], 0  ;;  %v34_v17 = vld [vmem:[%s1929_s2] sm:$0xff]  ;;  %vm46_vm2 = vcmask 261120   ;;  %v1696_v18 = vpack.c.bf16 %v200_v16, %v199_v15  ;;  %v202_v20 = vld [vmem:[%s1934_s7 + $0x28] sm:$0xff]  ;;  %v213_v37 = vlaneseq  ;;  %s1596_s26 = smov 2  }
   0x8   :  { %1357 = vmatpush3.bf16.msra.mxu0 %v1356_v11  ;;  %1070 = vmatmul.mubr.msk.f32.vlgmr.msra.gmra.mrb[0].mxu1 %vm123_vm1, %v120_v13  ;;  %v201_v19 = vld [vmem:[%s1934_s7 + $0x20] sm:$0xff]  ;;  %v203_v22 = vld [vmem:[%s1934_s7 + $0x30] sm:$0xff]  ;;  %v204_v23 = vld [vmem:[%s1934_s7 + $0x38] sm:$0xff]  ;;  %s1597_s3 = smov 3   ;;  %s1598_s27 = smov 4   ;;  %vm857_vm3 = vcmask 7168  }
   0x9   :  { %1385 = vmatprep.subr.bf16.mxu0 %v1592_v3  ;;  %1363 = vmatpush3.bf16.msra.mxu1 %v1682_v14  ;;  %v1712_v21 = vpack.c.bf16 %v202_v20, %v201_v19  ;;  %v1724_v24 = vpack.c.bf16 %v204_v23, %v203_v22  ;;  %v205_v25 = vld [vmem:[%s1934_s7 + $0x40] sm:$0xff]  ;;  %v206_v26 = vld [vmem:[%s1934_s7 + $0x48] sm:$0xff]  ;;  %v207_v28 = vld [vmem:[%s1934_s7 + $0x50] sm:$0xff]  ;;  %v214_v38 = vshrl.u32 %v213_v37, 7  ;;  %s1599_s28 = smov 5   ;;  %s1600_s29 = smov 6  }
   0xa   :  { %1364 = vmatprep.subr.bf16.mxu1 %v1592_v3  ;;  %1104 = vmatprep.mubr.msk.f32.mxu1 %vm1593_vm0, %v1594_v9  ;;  %v1736_v27 = vpack.c.bf16 %v206_v26, %v205_v25  ;;  %v208_v29 = vld [vmem:[%s1934_s7 + $0x58] sm:$0xff]  ;;  %v209_v31 = vld [vmem:[%s1934_s7 + $0x60] sm:$0xff]  ;;  %v210_v32 = vld [vmem:[%s1934_s7 + $0x68] sm:$0xff]  ;;  %s1601_s2 = smov 7   ;;  %vm859_vm4 = vcmask 15360   ;;  %vm861_vm5 = vcmask 23552  }
   0xb   :  { %1063 = vmatmul.mubr.msk.f32.vlgmr.msra.gmra.mrb[0].mxu0 %vm46_vm2, %v34_v17  ;;  %v1748_v30 = vpack.c.bf16 %v208_v29, %v207_v28  ;;  %v1763_v33 = vpack.c.bf16 %v210_v32, %v209_v31  ;;  %v211_v34 = vld [vmem:[%s1934_s7 + $0x70] sm:$0xff]  ;;  %v212_v35 = vld [vmem:[%s1934_s7 + $0x78] sm:$0xff]  ;;  %v215_v39 = vsub.s32 0, %v214_v38  ;;  %v292_v40 = vsub.s32 1, %v214_v38  ;;  %v906_v48 = vld [vmem:[%s1933_s6] ss:$0 sm:$0xff] }
   0xc   :  { %1387 = vmatpush3.bf16.msra.mxu0 %v1682_v14  ;;  %1139 = vmatprep.mubr.msk.f32.mxu0 %vm1593_vm0, %v1594_v9  ;;  %v1775_v36 = vpack.c.bf16 %v212_v35, %v211_v34  ;;  %v369_v41 = vsub.s32 2, %v214_v38  ;;  %v446_v42 = vsub.s32 3, %v214_v38  ;;  %v523_v43 = vsub.s32 4, %v214_v38  ;;  %s1595_s6 = smov 1  }
   0xd   :  { %1388 = vmatprep.subr.bf16.mxu0 %v1592_v3  ;;  %1366 = vmatpush3.bf16.msra.mxu1 %v1696_v18  ;;  %v600_v44 = vsub.s32 5, %v214_v38  ;;  %v677_v45 = vsub.s32 6, %v214_v38  ;;  %v754_v46 = vsub.s32 7, %v214_v38  ;;  %vm863_vm6 = vcmask 31744  }
   0xe   :  { %1367 = vmatprep.subr.bf16.mxu1 %v1592_v3  ;;  %vm865_vm7 = vcmask 39936   ;;  %vm867_vm8 = vcmask 48128   ;;  %vm869_vm9 = vcmask 56320   ;;  %vm875_vm10 = vcmask 64512  }
  0x10   :  { %1390 = vmatpush3.bf16.msra.mxu0 %v1696_v18 }
  0x11   :  { %1391 = vmatprep.subr.bf16.mxu0 %v1592_v3  ;;  %1369 = vmatpush3.bf16.msra.mxu1 %v1712_v21 }
  0x12   :  { %1370 = vmatprep.subr.bf16.mxu1 %v1592_v3 }
  0x14   :  { %1393 = vmatpush3.bf16.msra.mxu0 %v1712_v21 }
  0x15   :  { %1394 = vmatprep.subr.bf16.mxu0 %v1592_v3  ;;  %1372 = vmatpush3.bf16.msra.mxu1 %v1724_v24 }
  0x16   :  { %1373 = vmatprep.subr.bf16.mxu1 %v1592_v3 }
  0x18   :  { %1396 = vmatpush3.bf16.msra.mxu0 %v1724_v24 }
  0x19   :  { %1397 = vmatprep.subr.bf16.mxu0 %v1592_v3  ;;  %1375 = vmatpush3.bf16.msra.mxu1 %v1736_v27 }
  0x1a   :  { %1376 = vmatprep.subr.bf16.mxu1 %v1592_v3 }
  0x1c   :  { %1399 = vmatpush3.bf16.msra.mxu0 %v1736_v27 }
  0x1d   :  { %1400 = vmatprep.subr.bf16.mxu0 %v1592_v3  ;;  %1378 = vmatpush3.bf16.msra.mxu1 %v1748_v30 }
  0x1e   :  { %1379 = vmatprep.subr.bf16.mxu1 %v1592_v3 }
  0x20   :  { %1402 = vmatpush3.bf16.msra.mxu0 %v1748_v30 }
  0x21   :  { %1403 = vmatprep.subr.bf16.mxu0 %v1592_v3  ;;  %1381 = vmatpush3.bf16.msra.mxu1 %v1763_v33 }
  0x22   :  { %1382 = vmatprep.subr.bf16.mxu1 %v1592_v3 }
  0x24   :  { %1405 = vmatpush3.bf16.msra.mxu0 %v1763_v33 }
  0x25   :  { %1406 = vmatprep.subr.bf16.mxu0 %v1592_v3  ;;  %1384 = vmatpush3.bf16.msra.mxu1 %v1775_v36 }
  0x26   :  { %1409 = vmatprep.subr.bf16.mxu1 %v1592_v3 }
  0x28   :  { %1408 = vmatpush3.bf16.msra.mxu0 %v1775_v36 }
  0x29   :  { %1433 = vmatprep.subr.bf16.mxu0 %v1592_v3 }
  0xdb   :  { %v193_v47 = vpop.f32.mrb[0].mxu1 }
  0xdc   :  { %v1071_v49 = vpop.f32.mrb[1].mxu1  ;;  %v216_v50 = vrot.slane %v193_v47, %v215_v39  ;;  %v293_v51 = vrot.slane %v193_v47, %v292_v40  ;;  %v370_v52 = vrot.slane %v193_v47, %v369_v41  ;;  %v447_v53 = vrot.slane %v193_v47, %v446_v42 }
  0xdd   :  { %v524_v54 = vrot.slane %v193_v47, %v523_v43  ;;  %v601_v55 = vrot.slane %v193_v47, %v600_v44  ;;  %v678_v56 = vrot.slane %v193_v47, %v677_v45  ;;  %v755_v57 = vrot.slane %v193_v47, %v754_v46 }
  0xde   :  { %v116_v58 = vpop.f32.mrb[0].mxu0 }
  0xdf   :  { %v117_v59 = vadd.f32 %v906_v48, %v116_v58  ;;  %v1064_v60 = vpop.f32.mrb[1].mxu0  ;;  %v871_v48 = vstv %s1928_s1  ;;  %s1602_s1 = smov [#allocation4]  }
  0xe0   :  { %s898_s12 = sshll.u32 %s1602_s1, 4  ;;  %s899_s12 = int_to_ptr.vmem [resolvable:$true] %s898_s12 }
  0xe1   :  { %v217_v61 = vadd.f32 %v216_v50, %v117_v59  ;;  %v294_v62 = vadd.f32 %v293_v51, %v117_v59  ;;  %v371_v63 = vadd.f32 %v370_v52, %v117_v59  ;;  %v448_v0 = vadd.f32 %v447_v53, %v117_v59  ;;  %p1573_p1 = scmp.lt.s32.totalorder %s899_s12, %s899_s12 }
  0xe2   :  { %v1784_v1 = vadd.f32 %v524_v54, %v117_v59  ;;  %v1786_v2 = vadd.f32 %v601_v55, %v117_v59  ;;  %v1788_v4 = vadd.f32 %v678_v56, %v117_v59  ;;  %v1790_v5 = vadd.f32 %v755_v57, %v117_v59 }
  0xe3   :  { %v218_v6 = vmul.f32 0.1, %v217_v61  ;;  %v295_v7 = vmul.f32 0.1, %v294_v62  ;;  %v372_v11 = vmul.f32 0.1, %v371_v63  ;;  %v880_v55 = vstv %s1927_s0 }
  0xe4   :  { %v449_v12 = vmul.f32 0.1, %v448_v0  ;;  %v526_v16 = vmul.f32 0.1, %v1784_v1  ;;  %v603_v17 = vmul.f32 0.1, %v1786_v2 }
  0xe5   :  { %v219_v8 = vmax.f32 %v217_v61, %v218_v6  ;;  %v296_v10 = vmax.f32 %v294_v62, %v295_v7  ;;  %v373_v13 = vmax.f32 %v371_v63, %v372_v11  ;;  %s1568_s0 = scalar_lea.vmem %s899_s12, 128 }
  0xe6   :  { %v450_v15 = vmax.f32 %v448_v0, %v449_v12  ;;  %v527_v19 = vmax.f32 %v1784_v1, %v526_v16  ;;  %v604_v20 = vmax.f32 %v1786_v2, %v603_v17  ;;  %p1569_p0 = scmp.ne.s32.totalorder %s899_s12, %s1568_s0  ;;  %p1574_p2 = scmp.lt.s32.totalorder %s1568_s0, %s1568_s0 }
  0xe7   :  { %1105 = vmatmul.mubr.f32.vlgmr.msra.gmra.mrb[2].mxu1 %v219_v8  ;;  %1140 = vmatmul.mubr.f32.vlgmr.msra.gmra.mrb[2].mxu0 %v296_v10 }
  0xe8   :  { %1411 = vmatpush3.bf16.msra.mxu1 %v1682_v14  ;;  %1435 = vmatpush3.bf16.msra.mxu0 %v1682_v14  ;;  %p1575_p3 = por %p1574_p2, %p1573_p1 }
  0xe9   :  { %1412 = vmatprep.subr.bf16.mxu1 %v1592_v3  ;;  %1436 = vmatprep.subr.bf16.mxu0 %v1592_v3 }
  0xea   :  { %1174 = vmatprep.mubr.msk.f32.mxu1 %vm1593_vm0, %v1594_v9  ;;  %1209 = vmatprep.mubr.msk.f32.mxu0 %vm1593_vm0, %v1594_v9  ;;  %p1576_p4 = pnand %p1575_p3, %p1569_p0 }
  0xec   :  { %1414 = vmatpush3.bf16.msra.mxu1 %v1696_v18  ;;  %1438 = vmatpush3.bf16.msra.mxu0 %v1696_v18 }
  0xed   :  { %1415 = vmatprep.subr.bf16.mxu1 %v1592_v3  ;;  %1439 = vmatprep.subr.bf16.mxu0 %v1592_v3 }
  0xf0   :  { %1417 = vmatpush3.bf16.msra.mxu1 %v1712_v21  ;;  %1441 = vmatpush3.bf16.msra.mxu0 %v1712_v21 }
  0xf1   :  { %1418 = vmatprep.subr.bf16.mxu1 %v1592_v3  ;;  %1442 = vmatprep.subr.bf16.mxu0 %v1592_v3 }
  0xf4   :  { %1420 = vmatpush3.bf16.msra.mxu1 %v1724_v24  ;;  %1444 = vmatpush3.bf16.msra.mxu0 %v1724_v24 }
  0xf5   :  { %1421 = vmatprep.subr.bf16.mxu1 %v1592_v3  ;;  %1445 = vmatprep.subr.bf16.mxu0 %v1592_v3 }
  0xf8   :  { %1423 = vmatpush3.bf16.msra.mxu1 %v1736_v27  ;;  %1447 = vmatpush3.bf16.msra.mxu0 %v1736_v27 }
  0xf9   :  { %1424 = vmatprep.subr.bf16.mxu1 %v1592_v3  ;;  %1448 = vmatprep.subr.bf16.mxu0 %v1592_v3 }
  0xfc   :  { %1426 = vmatpush3.bf16.msra.mxu1 %v1748_v30  ;;  %1450 = vmatpush3.bf16.msra.mxu0 %v1748_v30 }
  0xfd   :  { %1427 = vmatprep.subr.bf16.mxu1 %v1592_v3  ;;  %1451 = vmatprep.subr.bf16.mxu0 %v1592_v3 }
 0x100   :  { %1429 = vmatpush3.bf16.msra.mxu1 %v1763_v33  ;;  %1453 = vmatpush3.bf16.msra.mxu0 %v1763_v33 }
 0x101   :  { %1430 = vmatprep.subr.bf16.mxu1 %v1592_v3  ;;  %1454 = vmatprep.subr.bf16.mxu0 %v1592_v3 }
 0x104   :  { %1432 = vmatpush3.bf16.msra.mxu1 %v1775_v36  ;;  %1456 = vmatpush3.bf16.msra.mxu0 %v1775_v36 }
 0x105   :  { %1457 = vmatprep.subr.bf16.mxu1 %v1592_v3  ;;  %1481 = vmatprep.subr.bf16.mxu0 %v1592_v3 }
 0x107   :  { %1175 = vmatmul.mubr.f32.vlgmr.msra.gmra.mrb[4].mxu1 %v373_v13  ;;  %1210 = vmatmul.mubr.f32.vlgmr.msra.gmra.mrb[4].mxu0 %v450_v15 }
 0x108   :  { %1459 = vmatpush3.bf16.msra.mxu1 %v1682_v14  ;;  %1483 = vmatpush3.bf16.msra.mxu0 %v1682_v14 }
 0x109   :  { %1460 = vmatprep.subr.bf16.mxu1 %v1592_v3  ;;  %1484 = vmatprep.subr.bf16.mxu0 %v1592_v3 }
 0x10a   :  { %1244 = vmatprep.mubr.msk.f32.mxu1 %vm1593_vm0, %v1594_v9  ;;  %1279 = vmatprep.mubr.msk.f32.mxu0 %vm1593_vm0, %v1594_v9 }
 0x10c   :  { %1462 = vmatpush3.bf16.msra.mxu1 %v1696_v18  ;;  %1486 = vmatpush3.bf16.msra.mxu0 %v1696_v18 }
 0x10d   :  { %1463 = vmatprep.subr.bf16.mxu1 %v1592_v3  ;;  %1487 = vmatprep.subr.bf16.mxu0 %v1592_v3 }
 0x110   :  { %1465 = vmatpush3.bf16.msra.mxu1 %v1712_v21  ;;  %1489 = vmatpush3.bf16.msra.mxu0 %v1712_v21 }
 0x111   :  { %1466 = vmatprep.subr.bf16.mxu1 %v1592_v3  ;;  %1490 = vmatprep.subr.bf16.mxu0 %v1592_v3 }
 0x114   :  { %1468 = vmatpush3.bf16.msra.mxu1 %v1724_v24  ;;  %1492 = vmatpush3.bf16.msra.mxu0 %v1724_v24 }
 0x115   :  { %1469 = vmatprep.subr.bf16.mxu1 %v1592_v3  ;;  %1493 = vmatprep.subr.bf16.mxu0 %v1592_v3 }
 0x118   :  { %1471 = vmatpush3.bf16.msra.mxu1 %v1736_v27  ;;  %1495 = vmatpush3.bf16.msra.mxu0 %v1736_v27 }
 0x119   :  { %1472 = vmatprep.subr.bf16.mxu1 %v1592_v3  ;;  %1496 = vmatprep.subr.bf16.mxu0 %v1592_v3 }
 0x11c   :  { %1474 = vmatpush3.bf16.msra.mxu1 %v1748_v30  ;;  %1498 = vmatpush3.bf16.msra.mxu0 %v1748_v30 }
 0x11d   :  { %1475 = vmatprep.subr.bf16.mxu1 %v1592_v3  ;;  %1499 = vmatprep.subr.bf16.mxu0 %v1592_v3 }
 0x120   :  { %1477 = vmatpush3.bf16.msra.mxu1 %v1763_v33  ;;  %1501 = vmatpush3.bf16.msra.mxu0 %v1763_v33 }
 0x121   :  { %1478 = vmatprep.subr.bf16.mxu1 %v1592_v3  ;;  %1502 = vmatprep.subr.bf16.mxu0 %v1592_v3 }
 0x124   :  { %1480 = vmatpush3.bf16.msra.mxu1 %v1775_v36  ;;  %1504 = vmatpush3.bf16.msra.mxu0 %v1775_v36 }
 0x125   :  { %1505 = vmatprep.subr.bf16.mxu1 %v1592_v3  ;;  %1529 = vmatprep.subr.bf16.mxu0 %v1592_v3 }
 0x127   :  { %1245 = vmatmul.mubr.f32.vlgmr.msra.gmra.mrb[6].mxu1 %v527_v19  ;;  %1280 = vmatmul.mubr.f32.vlgmr.msra.gmra.mrb[6].mxu0 %v604_v20 }
 0x128   :  { %1507 = vmatpush3.bf16.msra.mxu1 %v1682_v14  ;;  %1531 = vmatpush3.bf16.msra.mxu0 %v1682_v14  ;;  %v757_v14 = vmul.f32 0.1, %v1790_v5 }
 0x129   :  { %1508 = vmatprep.subr.bf16.mxu1 %v1592_v3  ;;  %1532 = vmatprep.subr.bf16.mxu0 %v1592_v3 }
 0x12a   :  { %1314 = vmatprep.mubr.msk.f32.mxu1 %vm1593_vm0, %v1594_v9  ;;  %1349 = vmatprep.mubr.msk.f32.mxu0 %vm1593_vm0, %v1594_v9  ;;  %v680_v9 = vmul.f32 0.1, %v1788_v4 }
 0x12c   :  { %1510 = vmatpush3.bf16.msra.mxu1 %v1696_v18  ;;  %1534 = vmatpush3.bf16.msra.mxu0 %v1696_v18  ;;  %v681_v18 = vmax.f32 %v1788_v4, %v680_v9 }
 0x12d   :  { %1511 = vmatprep.subr.bf16.mxu1 %v1592_v3  ;;  %1535 = vmatprep.subr.bf16.mxu0 %v1592_v3 }
 0x130   :  { %1513 = vmatpush3.bf16.msra.mxu1 %v1712_v21  ;;  %1537 = vmatpush3.bf16.msra.mxu0 %v1712_v21  ;;  %v758_v21 = vmax.f32 %v1790_v5, %v757_v14 }
 0x131   :  { %1514 = vmatprep.subr.bf16.mxu1 %v1592_v3  ;;  %1538 = vmatprep.subr.bf16.mxu0 %v1592_v3 }
 0x134   :  { %1516 = vmatpush3.bf16.msra.mxu1 %v1724_v24  ;;  %1540 = vmatpush3.bf16.msra.mxu0 %v1724_v24 }
 0x135   :  { %1517 = vmatprep.subr.bf16.mxu1 %v1592_v3  ;;  %1541 = vmatprep.subr.bf16.mxu0 %v1592_v3 }
 0x138   :  { %1519 = vmatpush3.bf16.msra.mxu1 %v1736_v27  ;;  %1543 = vmatpush3.bf16.msra.mxu0 %v1736_v27 }
 0x139   :  { %1520 = vmatprep.subr.bf16.mxu1 %v1592_v3  ;;  %1544 = vmatprep.subr.bf16.mxu0 %v1592_v3 }
 0x13c   :  { %1522 = vmatpush3.bf16.msra.mxu1 %v1748_v30  ;;  %1546 = vmatpush3.bf16.msra.mxu0 %v1748_v30 }
 0x13d   :  { %1523 = vmatprep.subr.bf16.mxu1 %v1592_v3  ;;  %1547 = vmatprep.subr.bf16.mxu0 %v1592_v3 }
 0x140   :  { %1525 = vmatpush3.bf16.msra.mxu1 %v1763_v33  ;;  %1549 = vmatpush3.bf16.msra.mxu0 %v1763_v33 }
 0x141   :  { %1526 = vmatprep.subr.bf16.mxu1 %v1592_v3  ;;  %1550 = vmatprep.subr.bf16.mxu0 %v1592_v3 }
 0x144   :  { %1528 = vmatpush3.bf16.msra.mxu1 %v1775_v36  ;;  %1552 = vmatpush3.bf16.msra.mxu0 %v1775_v36 }
 0x147   :  { %1315 = vmatmul.mubr.f32.vlgmr.msra.gmra.mrb[8].mxu1 %v681_v18  ;;  %1350 = vmatmul.mubr.f32.vlgmr.msra.gmra.mrb[8].mxu0 %v758_v21 }
 0x1ba   :  { %v286_v22 = vpop.f32.mrb[2].mxu1  ;;  %v363_v23 = vpop.f32.mrb[2].mxu0 }
 0x1bb   :  { %v1106_v24 = vpop.f32.mrb[3].mxu1  ;;  %830 = vrot.lane.b32.xlu0 %v363_v23, %s1595_s6  ;;  %v1141_v3 = vpop.f32.mrb[3].mxu0 }
 0x1da   :  { %v440_v25 = vpop.f32.mrb[4].mxu1  ;;  %v517_v26 = vpop.f32.mrb[4].mxu0 }
 0x1db   :  { %v1176_v27 = vpop.f32.mrb[5].mxu1  ;;  %834 = vrot.lane.b32.xlu0 %v440_v25, %s1596_s26  ;;  %838 = vrot.lane.b32.xlu1 %v517_v26, %s1597_s3  ;;  %v1211_v28 = vpop.f32.mrb[5].mxu0 }
 0x1fa   :  { %v594_v29 = vpop.f32.mrb[6].mxu1  ;;  %v671_v30 = vpop.f32.mrb[6].mxu0 }
 0x1fb   :  { %v1246_v31 = vpop.f32.mrb[7].mxu1  ;;  %842 = vrot.lane.b32.xlu1 %v594_v29, %s1598_s27  ;;  %846 = vrot.lane.b32.xlu0 %v671_v30, %s1599_s28  ;;  %v1281_v32 = vpop.f32.mrb[7].mxu0 }
 0x21a   :  { %v748_v33 = vpop.f32.mrb[8].mxu1  ;;  %v825_v34 = vpop.f32.mrb[8].mxu0 }
 0x21b   :  { %v1316_v35 = vpop.f32.mrb[9].mxu1  ;;  %850 = vrot.lane.b32.xlu1 %v748_v33, %s1600_s29  ;;  %854 = vrot.lane.b32.xlu0 %v825_v34, %s1601_s2  ;;  %v1351_v36 = vpop.f32.mrb[9].mxu0 }
 0x22d   :  { %v831_v37 = vpop.permute.xlu0 %830 }
 0x22e   :  { %v858_v40 = vsel %vm857_vm3, %v286_v22, %v831_v37 }
 0x24d   :  { %v835_v38 = vpop.permute.xlu0 %834  ;;  %v839_v39 = vpop.permute.xlu1 %838 }
 0x24e   :  { %v860_v41 = vsel %vm859_vm4, %v858_v40, %v835_v38 }
 0x24f   :  { %v862_v43 = vsel %vm861_vm5, %v860_v41, %v839_v39 }
 0x26d   :  { %v843_v42 = vpop.permute.xlu1 %842  ;;  %v847_v44 = vpop.permute.xlu0 %846 }
 0x26e   :  { %v864_v45 = vsel %vm863_vm6, %v862_v43, %v843_v42 }
 0x26f   :  { %v866_v46 = vsel %vm865_vm7, %v864_v45, %v847_v44 }
 0x28d   :  { %v851_v47 = vpop.permute.xlu1 %850  ;;  %v855_v49 = vpop.permute.xlu0 %854 }
 0x28e   :  { %v868_v50 = vsel %vm867_vm8, %v866_v46, %v851_v47 }
 0x28f   :  { %v870_v51 = vsel %vm869_vm9, %v868_v50, %v855_v49 }
 0x290   :  { %v872_v52 = vadd.f32 %v871_v48, %v870_v51 }
 0x292   :  { %v909_v53 = vclamps-f32 %v872_v52, 10.0 }
 0x294   :  { %v876_v54 = vsel %vm875_vm10, %v909_v53, -inf }
 0x295   :  { %877 = vmax.xlane.f32.xlu1 %v876_v54 }
 0x322   :  { %v878_v56 = vpop.xlane.xlu1 %877 }
 0x323   :  { %v879_v57 = vsub.f32 %v909_v53, %v878_v56 }
 0x325   :  { %v881_v58 = vmul.f32 %v880_v55, %v879_v57 }
 0x327   :  { %v882_v59 = vmul.f32 1.442695, %v881_v58 }
 0x329   :  { %1564 = vpow2.f32 %v882_v59 }
 0x333   :  { %v1565_v60 = vpop.eup %1564 }
 0x334   :  { %v884_v61 = vsel %vm875_vm10, %v1565_v60, 0.0 }
 0x335   :  { %885 = vadd.xlane.f32.xlu0 %v884_v61 }
 0x3c2   :  { %v886_v62 = vpop.xlane.xlu0 %885 }
 0x3c3   :  { %1566 = vrcp.f32 %v886_v62 }
 0x3cd   :  { %v1567_v63 = vpop.eup %1566 }
 0x3ce   :  { %v888_v0 = vmul.f32 %v1567_v63, %v1565_v60 }
 0x3d0   :  { %v889_v1 = vmax.f32 %v888_v0, 1e-06 }
 0x3d2   :  { %v890_v2 = vmin.f32 %v889_v1, 0.999999 }
 0x3d4   :  { %891 = vst.msk [vmem:[#allocation4] sm:$0xff] %vm875_vm10, %v890_v2 }
 0x3d5   :  { %1579 = shalt.err (!%p1576_p4)
}
 0x3d6   :  { %s1580_s15 = scalar_lea.hbm %s1935_s8, 128 }
 0x3d7   :  { %p1581_p5 = scmp.ne.s32.totalorder %s1935_s8, %s1580_s15  ;;  %p1584_p6 = scmp.lt.u32.totalorder %s1580_s15, %s1935_s8 }
 0x3d9   :  { %p1586_p7 = pnand %p1584_p6, %p1581_p5 }
 0x3db   :  { %1589 = shalt.err (!%p1586_p7)
}
 0x3dc   :  { %901 = dma.vmem_to_hbm [thread:$0]  %s899_s12, 128, %s1935_s8, [#allocation5]  }
 0x3dd   :  { %1590 = dma.done.wait [#allocation5], 128  }
 0x3de   :  { %1591 = vsyncadd [#allocation5], 4294967168 }
 0x3df   :  { %905 = vsyncpa [#allocation5], 1 }

</bundles_post_ra>
